<compile_context>
chip_gen: v7x
topology: tpu7x:2x2x1
jax: 0.10.0
libtpu: 0.0.40
codegen_flags: <defaults>
</compile_context>

<pallas_src>
import math

import numpy as np
import jax
import jax.numpy as jnp
from jax import lax
from jax.experimental import pallas as pl
from jax.experimental.pallas import tpu as pltpu

# ---- model / demo sizes ----------------------------------------------------
N_ATOMS = 300       # deliberately NOT a multiple of the tile -> exercises padding
N_DESC = 32         # n_descriptors
N_ELEMS = 2         # n_elements
HIDDEN = 32         # hidden width of the per-element MLP


def _choose_tm(n_atoms):
    """Atoms-per-tile bucket (static, trace-time).

    Small systems: limit padded-row waste (tanh/VPU work on zero rows).
    Large systems: amortize the ~0.35us per-grid-step overhead.
    Buckets keep the jit / pallas-config cache small, and give >=2 tiles for
    realistic atom counts so v7x's two TensorCores both get work (the grid
    axis is "parallel").
    """
    if n_atoms <= 512:
        return 128
    if n_atoms <= 2048:
        return 256
    if n_atoms <= 8192:
        return 512
    if n_atoms <= 32768:
        return 1024
    return 2048


def _mlp_energy_grad_kernel(x_ref, el_ref, colelem_ref, w1t_ref, b1_ref, w2_ref,
                            energy_ref, beta_t_ref):
    """Fused per-tile forward (energy) + analytic backward (beta = dE/dx)."""
    x = x_ref[...]                       # (TM, D)     float32
    el = el_ref[...]                     # (TM, 1)     int32, 0-based element id
    col_elem = colelem_ref[...]          # (1, EHP)    int32 column -> species id
    w1t = w1t_ref[...]                   # (D, EHP)    stacked, pre-transposed W1
    b1 = b1_ref[...]                     # (1, EHP)    stacked b1 (+ bias units)
    w2 = w2_ref[...]                     # (1, EHP)    stacked W2 (+ b2 in bias units)

    ehp = w1t.shape[1]

    # Per-atom masked readout weights: (1,EHP) vs (TM,1) compare broadcasts for
    # free; no iota / integer divide / cast / extra multiply in the hot path.
    g2 = jnp.where(col_elem == el, w2, jnp.float32(0.0))          # (TM, EHP)

    # One stacked matmul over all species (K = EHP); weights arrive already
    # transposed so nothing is transposed in the kernel.
    h = jnp.tanh(jnp.dot(x, w1t, preferred_element_type=jnp.float32) + b1)
    hg2 = h * g2                                                   # (TM, EHP)

    # Energy (incl. b2 via the folded bias units): MXU matvec -> lane-dense
    # (1, TM) row, unmasked TM-wide store.  MXU has huge slack here.
    ones = jnp.ones((1, ehp), jnp.float32)
    e_row = lax.dot_general(
        ones, hg2, dimension_numbers=(((1,), (1,)), ((), ())),
        preferred_element_type=jnp.float32)                        # (1, TM)
    energy_ref[...] = e_row.reshape(energy_ref.shape)

    # beta^T[d, n] = sum_k W1t[d, k] * g2[n, k] * (1 - h[n, k]^2)
    # reuse hg2:  g2*(1-h^2) == g2 - hg2*h.  NT matmul -> (D, TM) lane-dense.
    gsel = g2 - hg2 * h
    beta_t_ref[...] = lax.dot_general(
        w1t, gsel, dimension_numbers=(((1,), (1,)), ((), ())),
        preferred_element_type=jnp.float32)


def _energy_and_beta(x, elems0, w1t, b1s, w2s, col_elem):
    """Pad to a multiple of TM, run the tiled kernel, un-pad.

    Returns (energy (n_atoms,), beta^T (n_desc, n_atoms)), both float32.
    """
    n_atoms, n_desc = x.shape
    ehp = w1t.shape[1]
    tm = _choose_tm(n_atoms)
    n_pad = pl.cdiv(n_atoms, tm) * tm
    grid_n = n_pad // tm
    pad = n_pad - n_atoms
    if pad:
        x = jnp.pad(x, ((0, pad), (0, 0)))
        elems0 = jnp.pad(elems0, (0, pad))
    el2 = elems0.reshape(n_pad, 1).astype(jnp.int32)

    energy_rows, beta_t = pl.pallas_call(
        _mlp_energy_grad_kernel,
        out_shape=(
            jax.ShapeDtypeStruct((grid_n, 1, tm), jnp.float32),   # energy rows
            jax.ShapeDtypeStruct((n_desc, n_pad), jnp.float32),   # beta^T
        ),
        grid_spec=pltpu.PrefetchScalarGridSpec(
            num_scalar_prefetch=0,
            grid=(grid_n,),
            in_specs=[
                pl.BlockSpec((tm, n_desc), lambda i: (i, 0)),     # bispectrum tile
                pl.BlockSpec((tm, 1), lambda i: (i, 0)),          # element ids
                pl.BlockSpec((1, ehp), lambda i: (0, 0)),         # column->species
                pl.BlockSpec((n_desc, ehp), lambda i: (0, 0)),    # stacked W1^T
                pl.BlockSpec((1, ehp), lambda i: (0, 0)),         # stacked b1
                pl.BlockSpec((1, ehp), lambda i: (0, 0)),         # stacked W2 (+b2)
            ],
            out_specs=[
                pl.BlockSpec((1, 1, tm), lambda i: (i, 0, 0)),    # energy (lane-dense)
                pl.BlockSpec((n_desc, tm), lambda i: (0, i)),     # beta^T (lane-dense)
            ],
        ),
        compiler_params=pltpu.CompilerParams(
            dimension_semantics=("parallel",),
            vmem_limit_bytes=32 * 1024 * 1024),
    )(x, el2, col_elem, w1t, b1s, w2s)

    energy = energy_rows.reshape(n_pad)[:n_atoms]
    return energy, beta_t[:, :n_atoms]


# Compiled once per (n_atoms, n_desc, stacked-width) shape signature.
_energy_and_beta_jit = jax.jit(_energy_and_beta)


class JaxTorchWrapper:
    """Pallas/JAX port of TorchWrapper.forward for the per-species MLP model."""

    def __init__(self, params, n_descriptors, n_elements):
        w1, b1, w2, b2 = params            # (E,H,D), (E,H), (E,H), (E,1)
        ne, nh, nd = w1.shape
        assert ne == n_elements and nd == n_descriptors
        self.n_descriptors = n_descriptors
        self.n_elements = n_elements
        self.n_params = sum(int(np.prod(p.shape)) for p in params)

        # One-time weight preprocessing:
        #  * stack species along the hidden axis and pre-transpose W1,
        #  * append one "bias" hidden unit per species (w1 row = 0, b1 = 20 so
        #    tanh == 1.0 in f32, w2 = b2) -> b2 handled with zero kernel work
        #    and zero gradient contribution,
        #  * zero-pad each species block so the stacked width is a multiple of
        #    128 (clean lane layout / full MXU feed); pad columns contribute 0.
        target = 128 // math.gcd(ne, 128)
        nh_pad = -(-(nh + 1) // target) * target
        ehp = ne * nh_pad                               # multiple of 128

        w1np = np.asarray(w1, np.float32)
        b1np = np.asarray(b1, np.float32)
        w2np = np.asarray(w2, np.float32)
        b2np = np.asarray(b2, np.float32)

        w1t_s = np.zeros((nd, ehp), np.float32)
        b1_s = np.zeros((1, ehp), np.float32)
        w2_s = np.zeros((1, ehp), np.float32)
        col_elem = np.zeros((1, ehp), np.int32)
        for e in range(ne):
            lo = e * nh_pad
            w1t_s[:, lo:lo + nh] = w1np[e].T
            b1_s[0, lo:lo + nh] = b1np[e]
            w2_s[0, lo:lo + nh] = w2np[e]
            # bias unit: tanh(20.0) == 1.0 in float32; w1 row stays 0 so it
            # never touches the gradient.
            b1_s[0, lo + nh] = 20.0
            w2_s[0, lo + nh] = b2np[e, 0]
            col_elem[0, lo:lo + nh_pad] = e

        self._w1t = jnp.asarray(w1t_s)                  # (D, EHP)
        self._b1s = jnp.asarray(b1_s)                   # (1, EHP)
        self._w2s = jnp.asarray(w2_s)                   # (1, EHP)
        self._colelem = jnp.asarray(col_elem)           # (1, EHP) int32

    def forward(self, elems, bispectrum, beta, energy):
        # elems are 1-based species ids (matches `elems - 1` in the torch code).
        elems0 = jnp.asarray(np.asarray(elems), dtype=jnp.int32) - 1
        x = jnp.asarray(np.asarray(bispectrum), dtype=jnp.float32)
        energy_nn, beta_t_nn = _energy_and_beta_jit(
            x, elems0, self._w1t, self._b1s, self._w2s, self._colelem)
        # Single device->host transfer (blocks until the kernel completes).
        energy_np, beta_t_np = jax.device_get((energy_nn, beta_t_nn))
        # Transpose folded into the float64 cast-copy TorchWrapper does anyway.
        beta[:] = beta_t_np.T.astype(np.float64)
        energy[:] = energy_np.astype(np.float64)


def _make_params(key):
    k1, k2, k3, k4 = jax.random.split(key, 4)
    w1 = jax.random.normal(k1, (N_ELEMS, HIDDEN, N_DESC), jnp.float32) * 0.1
    b1 = jax.random.normal(k2, (N_ELEMS, HIDDEN), jnp.float32) * 0.1
    w2 = jax.random.normal(k3, (N_ELEMS, HIDDEN), jnp.float32) * 0.1
    b2 = jax.random.normal(k4, (N_ELEMS, 1), jnp.float32) * 0.1
    return w1, b1, w2, b2


def _reference(x, elems0, w1, b1, w2, b2):
    """Pure-JAX reference: forward + autodiff grad (mirrors torch.autograd.grad)."""
    def total_energy(xx):
        w1g, b1g, w2g, b2g = w1[elems0], b1[elems0], w2[elems0], b2[elems0]
        h = jnp.tanh(jnp.einsum("nhd,nd->nh", w1g, xx) + b1g)
        en = jnp.sum(h * w2g, axis=-1) + b2g[:, 0]
        return jnp.sum(en), en
    (_, en), beta = jax.value_and_grad(total_energy, has_aux=True)(x)
    return en, beta


if __name__ == "__main__":
    key = jax.random.PRNGKey(0)
    kp, ke, kx = jax.random.split(key, 3)

    params = _make_params(kp)
    wrapper = JaxTorchWrapper(params, n_descriptors=N_DESC, n_elements=N_ELEMS)

    # 1-based element ids, as LAMMPS passes them.
    elems = np.asarray(jax.random.randint(ke, (N_ATOMS,), 1, N_ELEMS + 1))
    bispectrum = np.asarray(
        jax.random.normal(kx, (N_ATOMS, N_DESC), jnp.float32), dtype=np.float64)

    # Direct kernel invocation + explicit block (300 atoms -> 3 tiles of 128).
    en_dev, beta_t_dev = _energy_and_beta_jit(
        jnp.asarray(bispectrum, jnp.float32),
        jnp.asarray(elems, jnp.int32) - 1,
        wrapper._w1t, wrapper._b1s, wrapper._w2s, wrapper._colelem)
    jax.block_until_ready((en_dev, beta_t_dev))

    # Full TorchWrapper.forward-style call (fills float64 beta / energy in place).
    beta = np.zeros((N_ATOMS, N_DESC), dtype=np.float64)
    energy = np.zeros((N_ATOMS,), dtype=np.float64)
    wrapper.forward(elems, bispectrum, beta, energy)

    # Cross-check against a pure-JAX autodiff reference.
    en_ref, beta_ref = _reference(
        jnp.asarray(bispectrum, jnp.float32),
        jnp.asarray(elems, jnp.int32) - 1, *params)
    np.testing.assert_allclose(energy, np.asarray(en_ref), rtol=1e-4, atol=1e-5)
    np.testing.assert_allclose(beta, np.asarray(beta_ref), rtol=1e-4, atol=1e-5)

    print("KERNEL_OK")
</pallas_src>

<mosaic_0001>
module attributes {stable_mosaic.version = 11 : i64} {
  func.func @_mlp_energy_grad_kernel(%arg0: i32, %arg1: memref<128x32xf32, #tpu.memory_space<vmem>>, %arg2: memref<128x1xi32, #tpu.memory_space<vmem>>, %arg3: memref<1x128xi32, #tpu.memory_space<vmem>>, %arg4: memref<32x128xf32, #tpu.memory_space<vmem>>, %arg5: memref<1x128xf32, #tpu.memory_space<vmem>>, %arg6: memref<1x128xf32, #tpu.memory_space<vmem>>, %arg7: memref<1x1x128xf32, #tpu.memory_space<vmem>>, %arg8: memref<32x128xf32, #tpu.memory_space<vmem>>) attributes {dimension_semantics = [#tpu.dimension_semantics<parallel>], iteration_bounds = array<i64: 3>, scalar_prefetch = 0 : i64, scratch_operands = 0 : i64, tpu.core_type = #tpu.core_type<tc>, window_params = [{transform_indices = @transform_0, window_bounds = array<i64: 128, 32>}, {transform_indices = @transform_1, window_bounds = array<i64: 128, 1>}, {pipeline_mode = #tpu.pipeline_mode<synchronous>, transform_indices = @transform_2, window_bounds = array<i64: 1, 128>}, {pipeline_mode = #tpu.pipeline_mode<synchronous>, transform_indices = @transform_3, window_bounds = array<i64: 32, 128>}, {pipeline_mode = #tpu.pipeline_mode<synchronous>, transform_indices = @transform_4, window_bounds = array<i64: 1, 128>}, {pipeline_mode = #tpu.pipeline_mode<synchronous>, transform_indices = @transform_5, window_bounds = array<i64: 1, 128>}, {transform_indices = @transform_6, window_bounds = array<i64: 1, 1, 128>}, {transform_indices = @transform_7, window_bounds = array<i64: 32, 128>}]} {
    %c0 = arith.constant 0 : index
    %c0_0 = arith.constant 0 : index
    %0 = vector.load %arg1[%c0, %c0_0] : memref<128x32xf32, #tpu.memory_space<vmem>>, vector<128x32xf32>
    %c0_1 = arith.constant 0 : index
    %c0_2 = arith.constant 0 : index
    %1 = vector.load %arg2[%c0_1, %c0_2] : memref<128x1xi32, #tpu.memory_space<vmem>>, vector<128x1xi32>
    %c0_3 = arith.constant 0 : index
    %c0_4 = arith.constant 0 : index
    %2 = vector.load %arg3[%c0_3, %c0_4] : memref<1x128xi32, #tpu.memory_space<vmem>>, vector<1x128xi32>
    %c0_5 = arith.constant 0 : index
    %c0_6 = arith.constant 0 : index
    %3 = vector.load %arg4[%c0_5, %c0_6] : memref<32x128xf32, #tpu.memory_space<vmem>>, vector<32x128xf32>
    %c0_7 = arith.constant 0 : index
    %c0_8 = arith.constant 0 : index
    %4 = vector.load %arg5[%c0_7, %c0_8] : memref<1x128xf32, #tpu.memory_space<vmem>>, vector<1x128xf32>
    %c0_9 = arith.constant 0 : index
    %c0_10 = arith.constant 0 : index
    %5 = vector.load %arg6[%c0_9, %c0_10] : memref<1x128xf32, #tpu.memory_space<vmem>>, vector<1x128xf32>
    %6 = vector.broadcast %2 : vector<1x128xi32> to vector<128x128xi32>
    %7 = vector.broadcast %1 : vector<128x1xi32> to vector<128x128xi32>
    %8 = arith.cmpi eq, %6, %7 : vector<128x128xi32>
    %cst = arith.constant 0.000000e+00 : f32
    %9 = vector.shape_cast %5 : vector<1x128xf32> to vector<1x128xf32>
    %10 = vector.broadcast %9 : vector<1x128xf32> to vector<128x128xf32>
    %11 = vector.broadcast %cst : f32 to vector<128x128xf32>
    %12 = arith.select %8, %10, %11 : vector<128x128xi1>, vector<128x128xf32>
    %cst_11 = arith.constant dense<0.000000e+00> : vector<128x128xf32>
    %13 = tpu.matmul %0, %3, %cst_11 {dimension_numbers = #tpu.dot_dimension_numbers<[1], [0], [0], [1], [0, 0, 1, 1], [], []>} : vector<128x32xf32>, vector<32x128xf32>, vector<128x128xf32> -> vector<128x128xf32>
    %14 = vector.broadcast %4 : vector<1x128xf32> to vector<128x128xf32>
    %15 = arith.addf %13, %14 : vector<128x128xf32>
    %16 = math.tanh %15 : vector<128x128xf32>
    %17 = arith.mulf %16, %12 : vector<128x128xf32>
    %cst_12 = arith.constant 1.000000e+00 : f32
    %18 = vector.broadcast %cst_12 : f32 to vector<1x128xf32>
    %cst_13 = arith.constant dense<0.000000e+00> : vector<1x128xf32>
    %19 = tpu.matmul %18, %17, %cst_13 {dimension_numbers = #tpu.dot_dimension_numbers<[1], [1], [0], [0], [0, 0, 1, 0], [], []>} : vector<1x128xf32>, vector<128x128xf32>, vector<1x128xf32> -> vector<1x128xf32>
    %20 = vector.shape_cast %19 : vector<1x128xf32> to vector<1x1x128xf32>
    %c0_14 = arith.constant 0 : index
    %c0_15 = arith.constant 0 : index
    %c0_16 = arith.constant 0 : index
    %21 = vector.load %arg7[%c0_14, %c0_15, %c0_16] : memref<1x1x128xf32, #tpu.memory_space<vmem>>, vector<1x1x128xf32>
    tpu.vector_store %arg7[%c0_14, %c0_15, %c0_16], %20 {strides = array<i32>} : memref<1x1x128xf32, #tpu.memory_space<vmem>>, vector<1x1x128xf32>,
    %22 = arith.mulf %17, %16 : vector<128x128xf32>
    %23 = arith.subf %12, %22 : vector<128x128xf32>
    %cst_17 = arith.constant dense<0.000000e+00> : vector<32x128xf32>
    %24 = tpu.matmul %3, %23, %cst_17 {dimension_numbers = #tpu.dot_dimension_numbers<[1], [1], [0], [0], [0, 0, 1, 0], [], []>} : vector<32x128xf32>, vector<128x128xf32>, vector<32x128xf32> -> vector<32x128xf32>
    %c0_18 = arith.constant 0 : index
    %c0_19 = arith.constant 0 : index
    %25 = vector.load %arg8[%c0_18, %c0_19] : memref<32x128xf32, #tpu.memory_space<vmem>>, vector<32x128xf32>
    tpu.vector_store %arg8[%c0_18, %c0_19], %24 {strides = array<i32>} : memref<32x128xf32, #tpu.memory_space<vmem>>, vector<32x128xf32>,
    return
  }
  func.func @transform_0(%arg0: i32) -> (i32, i32) {
    %c0_i32 = arith.constant 0 : i32
    %c0_i32_0 = arith.constant 0 : i32
    return %arg0, %c0_i32 : i32, i32
  }
  func.func @transform_1(%arg0: i32) -> (i32, i32) {
    %c0_i32 = arith.constant 0 : i32
    %c0_i32_0 = arith.constant 0 : i32
    return %arg0, %c0_i32 : i32, i32
  }
  func.func @transform_2(%arg0: i32) -> (i32, i32) {
    %c0_i32 = arith.constant 0 : i32
    %c0_i32_0 = arith.constant 0 : i32
    %c0_i32_1 = arith.constant 0 : i32
    return %c0_i32, %c0_i32_0 : i32, i32
  }
  func.func @transform_3(%arg0: i32) -> (i32, i32) {
    %c0_i32 = arith.constant 0 : i32
    %c0_i32_0 = arith.constant 0 : i32
    %c0_i32_1 = arith.constant 0 : i32
    return %c0_i32, %c0_i32_0 : i32, i32
  }
  func.func @transform_4(%arg0: i32) -> (i32, i32) {
    %c0_i32 = arith.constant 0 : i32
    %c0_i32_0 = arith.constant 0 : i32
    %c0_i32_1 = arith.constant 0 : i32
    return %c0_i32, %c0_i32_0 : i32, i32
  }
  func.func @transform_5(%arg0: i32) -> (i32, i32) {
    %c0_i32 = arith.constant 0 : i32
    %c0_i32_0 = arith.constant 0 : i32
    %c0_i32_1 = arith.constant 0 : i32
    return %c0_i32, %c0_i32_0 : i32, i32
  }
  func.func @transform_6(%arg0: i32) -> (i32, i32, i32) {
    %c0_i32 = arith.constant 0 : i32
    %c0_i32_0 = arith.constant 0 : i32
    %c0_i32_1 = arith.constant 0 : i32
    return %arg0, %c0_i32, %c0_i32_0 : i32, i32, i32
  }
  func.func @transform_7(%arg0: i32) -> (i32, i32) {
    %c0_i32 = arith.constant 0 : i32
    %c0_i32_0 = arith.constant 0 : i32
    return %c0_i32, %arg0 : i32, i32
  }
}

</mosaic_0001>

<bundles_post_ra>
// kernel: _energy_and_beta.1
= control target key start
LH: loop header
LB: loop body
LE: loop exit
PB: predicated region body
PF: predicated region fallthrough
CT: control target
= control target key end

     0   :  { %13 = vsyncpa [#allocation3], 0  ;;  %s1724_s0 = inlined_call_operand.vmem [shape: f32[384,32], index: 0, kind: input, shape index: {}]   ;;  %s1725_s1 = inlined_call_operand.vmem [shape: s32[384,1], index: 1, kind: input, shape index: {}]   ;;  %s1726_s2 = inlined_call_operand.vmem [shape: s32[1,128], index: 2, kind: input, shape index: {}]   ;;  %s1727_s3 = inlined_call_operand.vmem [shape: f32[32,128], index: 3, kind: input, shape index: {}]   ;;  %s1728_s4 = inlined_call_operand.vmem [shape: f32[1,128], index: 4, kind: input, shape index: {}]   ;;  %s1729_s5 = inlined_call_operand.vmem [shape: f32[1,128], index: 5, kind: input, shape index: {}]   ;;  %s1730_s6 = inlined_call_operand.vmem [shape: f32[3,1,128], index: 6, kind: output, shape index: {0}]   ;;  %s1731_s7 = inlined_call_operand.hbm [shape: f32[32,384], index: 7, kind: output, shape index: {1}]  }
   0x1   :  { %15 = vsyncpa [#allocation3 + $0x1], 0  ;;  %s1427_s24 = smov 0   ;;  %s1429_s25 = smov 0  }
   0x2   :  { %s1431_s26 = smov 0   ;;  %s1433_s27 = smov 0  }
   0x3 LB: > { %s1448_s28 = sadd.s32 4294967295, %s1376_s27   ;;  %s975_s29 = sadd.s32 4294967294, %s1376_s27   ;;  %s1376_s27 = sphi %s1433_s27, %s1737_s27   ;;  %s1372_s26 = sphi %s1431_s26, %s1736_s26   ;;  %s1368_s25 = sphi %s1429_s25, %s1735_s25   ;;  %s1364_s24 = sphi %s1427_s24, %s1734_s24  }
   0x4   : > { %s1452_s30 = sadd.s32 1, %s1376_s27   ;;  %s190_s8 = sadd.s32 1, %s1372_s26 }
   0x5   : > { %s187_s9 = ssub.s32 %s1376_s27, %s1452_s30  ;;  %p200_p0 = scmp.ne.s32.totalorder %s1372_s26, %s1368_s25 }
   0x6   : > { %p188_p1 = scmp.eq.s32.totalorder %s187_s9, 0  ;;  %p201_p2 = scmp.eq.s32.totalorder %s1448_s28, 2 }
   0x7   : > { %p206_p3 = scmp.ne.s32.totalorder %s1368_s25, %s1364_s24  ;;  %p207_p4 = scmp.eq.s32.totalorder %s975_s29, 2 }
   0x8   : > { %s1463_s10 = scalar_select %p188_p1, %s1372_s26, %s190_s8  }
   0x9   : > { %p1465_p5 = por %p201_p2, %p200_p0  ;;  %p1469_p6 = por %p207_p4, %p206_p3 }
   0xa   : > { %p978_p7 = scmp.ge.s32.totalorder %s1376_s27, 1  ;;  %p255_p8 = scmp.lt.s32.totalorder %s1376_s27, 4 }
   0xc   : > { %p256_p9 = pnand %p978_p7, %p255_p8 }
   0xd   : > { %v343_v0 = vld [vmem:[%s1727_s3] sm:$0xff] (!%p256_p9)  ;;  %v1481_v1 = vld [vmem:[%s1727_s3 + $0x8] sm:$0xff] (!%p256_p9)  ;;  %v1486_v2 = vld [vmem:[%s1727_s3 + $0x10] sm:$0xff] (!%p256_p9)  ;;  %s980_s19 = sshll.u32 (!%p256_p9), %s1448_s28, 4  ;;  %v1378_v5 = vmov (!%p256_p9), 0   ;;  %vm445_vm0 = vcmask (!%p256_p9), 261120  }
   0xe   : > { %259 = sbr.rel (%p256_p9) target bundleno = 557 (0x22d), region = 44  ;;  %v1169_v3 = vpack.c.bf16 (!%p256_p9), %v1481_v1, %v343_v0  ;;  %v1493_v4 = vld [vmem:[%s1727_s3 + $0x18] sm:$0xff] (!%p256_p9)  ;;  %p296_p10 = scmp.lt.s32.totalorder (!%p256_p9), %s980_s19, 47  ;;  %1280 = vset.pattern.permute.xlu0 (!%p256_p9), %v1378_v5  ;;  %1281 = vset.pattern.permute.xlu1 (!%p256_p9), %v1378_v5  ;;  %v1379_v39 = vmov (!%p256_p9), 0.0|0.0   ;;  %vm1380_vm1 = vmmov (!%p256_p9), 0   ;;  %v1381_v40 = vmov (!%p256_p9), 0.0  }
   0xf   : > { %v1173_v6 = vpack.c.bf16 (!%p256_p9), %v1493_v4, %v1486_v2  ;;  %1163 = vmatprep.mubr.f32.mxu0 (!%p256_p9), %v343_v0  ;;  %v1559_v43 = vld [vmem:[%s1728_s4] ss:$0 sm:$0xff] (!%p256_p9)  ;;  %p307_p11 = scmp.lt.s32.totalorder (!%p256_p9), %s1448_s28, 2  ;;  %s1004_s15 = sshll.u32 (!%p256_p9), %s1448_s28, 7 }
  0x10   : > { %1170 = vmatprep.subr.bf16.mxu1 (!%p256_p9), %v1169_v3  ;;  %v1568_v56 = vld [vmem:[%s1726_s2] ss:$0 sm:$0xff] (!%p256_p9)  ;;  %s1681_s18 = scalar_lea.hbm (!%p256_p9), %s1731_s7, %s1004_s15  ;;  %s1383_s20 = smov (!%p256_p9), [#allocation2]  }
  0x11   : > { %1172 = vmatpush3.bf16.msra.mxu1 (!%p256_p9), %v1169_v3  ;;  %v1574_v60 = vld [vmem:[%s1729_s5] ss:$0 sm:$0xff] (!%p256_p9) }
  0x12   : > { %1174 = vmatprep.subr.bf16.mxu1 (!%p256_p9), %v1173_v6 }
  0x15   : > { %s1739_s19 = smov (!%p296_p10, %s980_s19), 47  ;;  %1176 = vmatpush3.bf16.msra.mxu1 %v1173_v6 }
  0x16   : > { %s981_s22 = sshll.u32 %s1739_s19, 3  ;;  %1177 = vmatprep.subr.bf16.mxu1 %v1379_v39 }
  0x17   : > { %s1500_s8 = scalar_lea.vmem %s1724_s0, %s981_s22  ;;  %s1509_s14 = scalar_lea.vmem %s1725_s1, %s981_s22 }
  0x18   : > { %v310_v7 = vld [vmem:[%s1500_s8] sm:$0xff]  ;;  %v311_v8 = vld [vmem:[%s1500_s8 + $0x8] sm:$0xff]  ;;  %v312_v9 = vld [vmem:[%s1500_s8 + $0x10] sm:$0xff]  ;;  %s308_s21 = scalar_select %p307_p11, %s1448_s28, 2 }
  0x19   : > { %1072 = vmatprep.mubr.msk.f32.mxu1 %vm445_vm0, %v310_v7  ;;  %v313_v10 = vld [vmem:[%s1500_s8 + $0x18] sm:$0xff]  ;;  %v326_v11 = vld [vmem:[%s1509_s14] sm:$0xff]  ;;  %v328_v13 = vld [vmem:[%s1509_s14 + $0x10] sm:$0xff]  ;;  %s292_s22 = sand.u32 1, %s1368_s25  }
  0x1a   : > { %1073 = vmatmul.mubr.msk.f32.vlgmr.msra.gmra.mrb[0].mxu1 %vm445_vm0, %v311_v8  ;;  %v314_v12 = vld [vmem:[%s1500_s8 + $0x20] sm:$0xff]  ;;  %354 = vperm.xlu0 %1280, %v326_v11   ;;  %v327_v14 = vld [vmem:[%s1509_s14 + $0x8] sm:$0xff]  ;;  %v329_v15 = vld [vmem:[%s1509_s14 + $0x18] sm:$0xff]  ;;  %s979_s9 = sshll.u32 %s292_s22, 5  ;;  %s1683_s19 = scalar_lea.sflag [#allocation3], %s292_s22 }
  0x1b   : > { %1075 = vmatprep.mubr.msk.f32.mxu1 %vm445_vm0, %v312_v9  ;;  %360 = vperm.xlu1 %1281, %v328_v13   ;;  %v315_v16 = vld [vmem:[%s1500_s8 + $0x28] sm:$0xff]  ;;  %v316_v17 = vld [vmem:[%s1500_s8 + $0x30] sm:$0xff]  ;;  %v330_v18 = vld [vmem:[%s1509_s14 + $0x20] sm:$0xff]  ;;  %s294_s13 = scalar_lea.vmem [#allocation2], %s979_s9 }
  0x1c   : > { %v331_v19 = vld [vmem:[%s1509_s14 + $0x28] sm:$0xff]  ;;  %v317_v20 = vld [vmem:[%s1500_s8 + $0x38] sm:$0xff]  ;;  %v318_v21 = vld [vmem:[%s1500_s8 + $0x40] sm:$0xff] }
  0x1d   : > { %v332_v22 = vld [vmem:[%s1509_s14 + $0x30] sm:$0xff]  ;;  %v333_v23 = vld [vmem:[%s1509_s14 + $0x38] sm:$0xff]  ;;  %v319_v24 = vld [vmem:[%s1500_s8 + $0x48] sm:$0xff] }
  0x1e   : > { %1076 = vmatmul.mubr.msk.f32.gmra.mrb[2].mxu1 %vm445_vm0, %v313_v10  ;;  %357 = vperm.xlu0 %1280, %v327_v14   ;;  %v320_v25 = vld [vmem:[%s1500_s8 + $0x50] sm:$0xff]  ;;  %v334_v26 = vld [vmem:[%s1509_s14 + $0x40] sm:$0xff]  ;;  %v335_v27 = vld [vmem:[%s1509_s14 + $0x48] sm:$0xff] }
  0x1f   : > { %1078 = vmatprep.mubr.msk.f32.mxu1 %vm445_vm0, %v314_v12  ;;  %363 = vperm.xlu1 %1281, %v329_v15   ;;  %v321_v28 = vld [vmem:[%s1500_s8 + $0x58] sm:$0xff]  ;;  %v322_v29 = vld [vmem:[%s1500_s8 + $0x60] sm:$0xff]  ;;  %v336_v30 = vld [vmem:[%s1509_s14 + $0x50] sm:$0xff] }
  0x20   : > { %v337_v31 = vld [vmem:[%s1509_s14 + $0x58] sm:$0xff]  ;;  %v323_v32 = vld [vmem:[%s1500_s8 + $0x68] sm:$0xff]  ;;  %v324_v33 = vld [vmem:[%s1500_s8 + $0x70] sm:$0xff] }
  0x21   : > { %v338_v34 = vld [vmem:[%s1509_s14 + $0x60] sm:$0xff]  ;;  %v339_v35 = vld [vmem:[%s1509_s14 + $0x68] sm:$0xff]  ;;  %v325_v36 = vld [vmem:[%s1500_s8 + $0x78] sm:$0xff]  ;;  %s309_s8 = scalar_lea.vmem %s1730_s6, %s308_s21  ;;  %s1318_s21 = sshll.u32 %s1383_s20, 4  ;;  %s1319_s21 = int_to_ptr.vmem [resolvable:$false] %s1318_s21 }
  0x22   : > { %1079 = vmatmul.mubr.msk.f32.gmra.mrb[4].mxu1 %vm445_vm0, %v315_v16  ;;  %366 = vperm.xlu0 %1280, %v330_v18   ;;  %v340_v37 = vld [vmem:[%s1509_s14 + $0x70] sm:$0xff]  ;;  %v341_v38 = vld [vmem:[%s1509_s14 + $0x78] sm:$0xff]  ;;  %s882_s14 = sshll.u32 %s294_s13, 4  ;;  %s1320_s23 = scalar_lea.vmem %s1319_s21, 1024  ;;  %s1676_s14 = int_to_ptr.vmem [resolvable:$true] %s882_s14 }
  0x23   : > { %1081 = vmatprep.mubr.msk.f32.mxu1 %vm445_vm0, %v316_v17  ;;  %369 = vperm.xlu1 %1281, %v331_v19   ;;  %s1314_s28 = scalar_lea.vmem %s1676_s14, 512  ;;  %p1321_p1 = scmp.lt.s32.totalorder %s1676_s14, %s1319_s21 }
  0x24   : > { %p1315_p12 = scmp.ne.s32.totalorder %s1676_s14, %s1314_s28  ;;  %p1322_p2 = scmp.lt.s32.totalorder %s1320_s23, %s1314_s28 }
  0x26   : > { %1082 = vmatmul.mubr.msk.f32.gmra.mrb[6].mxu1 %vm445_vm0, %v317_v20  ;;  %372 = vperm.xlu0 %1280, %v332_v22   ;;  %p1316_p13 = pnand %p1315_p12, %p1465_p5  ;;  %p1323_p3 = por %p1322_p2, %p1321_p1 }
  0x27   : > { %1084 = vmatprep.mubr.msk.f32.mxu1 %vm445_vm0, %v318_v21  ;;  %375 = vperm.xlu1 %1281, %v333_v23  }
  0x28   : > { %p1317_p0 = pneg %p1316_p13 }
  0x2a   : > { %1085 = vmatmul.mubr.msk.f32.gmra.mrb[8].mxu1 %vm445_vm0, %v319_v24  ;;  %378 = vperm.xlu0 %1280, %v334_v26   ;;  %p1324_p4 = pnand %p1323_p3, %p1317_p0 }
  0x2b   : > { %1087 = vmatprep.mubr.msk.f32.mxu1 %vm445_vm0, %v320_v25  ;;  %381 = vperm.xlu1 %1281, %v335_v27  }
  0x2e   : > { %1088 = vmatmul.mubr.msk.f32.gmra.mrb[10].mxu1 %vm445_vm0, %v321_v28  ;;  %384 = vperm.xlu0 %1280, %v336_v30  }
  0x2f   : > { %1090 = vmatprep.mubr.msk.f32.mxu1 %vm445_vm0, %v322_v29  ;;  %387 = vperm.xlu1 %1281, %v337_v31  }
  0x32   : > { %1091 = vmatmul.mubr.msk.f32.gmra.mrb[12].mxu1 %vm445_vm0, %v323_v32  ;;  %390 = vperm.xlu0 %1280, %v338_v34  }
  0x33   : > { %1093 = vmatprep.mubr.msk.f32.mxu1 %vm445_vm0, %v324_v33  ;;  %393 = vperm.xlu1 %1281, %v339_v35  }
  0x36   : > { %1094 = vmatmul.mubr.msk.f32.gmra.mrb[14].mxu1 %vm445_vm0, %v325_v36  ;;  %396 = vperm.xlu0 %1280, %v340_v37  }
  0x37   : > { %399 = vperm.xlu1 %1281, %v341_v38   ;;  %1128 = vmatprep.mubr.msk.f32.mxu1 %vm1380_vm1, %v1381_v40 }
  0x99   : > { %v355_v42 = vpop.permute.xlu0 %354 }
  0x9a   : > { %v361_v41 = vpop.permute.xlu1 %360  ;;  %vm401_vm3 = vcmp.eq.s32.totalorder %v1568_v56, %v355_v42 }
  0x9b   : > { %vm403_vm5 = vcmp.eq.s32.totalorder %v1568_v56, %v361_v41  ;;  %v423_v9 = vsel %vm401_vm3, %v1574_v60, 0.0 }
  0x9c   : > { %v425_v14 = vsel %vm403_vm5, %v1574_v60, 0.0 }
  0x9d   : > { %v358_v45 = vpop.permute.xlu0 %357 }
  0x9e   : > { %v364_v44 = vpop.permute.xlu1 %363  ;;  %vm402_vm2 = vcmp.eq.s32.totalorder %v1568_v56, %v358_v45 }
  0x9f   : > { %vm404_vm4 = vcmp.eq.s32.totalorder %v1568_v56, %v364_v44  ;;  %v424_v5 = vsel %vm402_vm2, %v1574_v60, 0.0 }
  0xa0   : > { %v426_v12 = vsel %vm404_vm4, %v1574_v60, 0.0 }
  0xa1   : > { %v367_v54 = vpop.permute.xlu0 %366 }
  0xa2   : > { %v370_v51 = vpop.permute.xlu1 %369  ;;  %vm405_vm6 = vcmp.eq.s32.totalorder %v1568_v56, %v367_v54 }
  0xa3   : > { %vm406_vm7 = vcmp.eq.s32.totalorder %v1568_v56, %v370_v51  ;;  %v427_v28 = vsel %vm405_vm6, %v1574_v60, 0.0 }
  0xa4   : > { %v428_v31 = vsel %vm406_vm7, %v1574_v60, 0.0 }
  0xa5   : > { %v1580_v63 = vpop.permute.xlu0 %372 }
  0xa6   : > { %v376_v62 = vpop.permute.xlu1 %375  ;;  %vm407_vm9 = vcmp.eq.s32.totalorder %v1568_v56, %v1580_v63 }
  0xa7   : > { %vm408_vm8 = vcmp.eq.s32.totalorder %v1568_v56, %v376_v62  ;;  %v429_v62 = vsel %vm407_vm9, %v1574_v60, 0.0 }
  0xa9   : > { %v379_v24 = vpop.permute.xlu0 %378 }
  0xaa   : > { %v1591_v18 = vpop.permute.xlu1 %381  ;;  %vm409_vm10 = vcmp.eq.s32.totalorder %v1568_v56, %v379_v24 }
  0xab   : > { %vm410_vm11 = vcmp.eq.s32.totalorder %v1568_v56, %v1591_v18 }
  0xac   : > { %v432_v63 = vsel %vm410_vm11, %v1574_v60, 0.0 }
  0xed   : > { %v1074_v46 = vpop.f32.mrb[0].mxu1 }
  0xee   : > { %v566_v47 = vadd.f32 %v1074_v46, %v1559_v43  ;;  %v560_v48 = vpop.f32.mrb[1].mxu1  ;;  %v430_v46 = vsel %vm408_vm8, %v1574_v60, 0.0 }
  0xef   : > { %v561_v49 = vadd.f32 %v1559_v43, %v560_v48 }
  0xf0   : > { %1282 = vtanh.f32 %v566_v47  ;;  %v388_v47 = vpop.permute.xlu1 %387 }
  0xf1   : > { %1284 = vtanh.f32 %v561_v49  ;;  %v1077_v50 = vpop.f32.mrb[2].mxu1  ;;  %vm412_vm12 = vcmp.eq.s32.totalorder %v1568_v56, %v388_v47 }
  0xf2   : > { %v576_v52 = vadd.f32 %v1077_v50, %v1559_v43  ;;  %v570_v53 = vpop.f32.mrb[3].mxu1  ;;  %v385_v50 = vpop.permute.xlu0 %384 }
  0xf3   : > { %v571_v55 = vadd.f32 %v1559_v43, %v570_v53  ;;  %vm411_vm13 = vcmp.eq.s32.totalorder %v1568_v56, %v385_v50 }
  0xf4   : > { %1286 = vtanh.f32 %v576_v52 }
  0xf5   : > { %1288 = vtanh.f32 %v571_v55  ;;  %v1080_v57 = vpop.f32.mrb[4].mxu1 }
  0xf6   : > { %v586_v58 = vadd.f32 %v1080_v57, %v1559_v43  ;;  %v580_v59 = vpop.f32.mrb[5].mxu1  ;;  %v391_v18 = vpop.permute.xlu0 %390 }
  0xf7   : > { %v581_v61 = vadd.f32 %v1559_v43, %v580_v59  ;;  %vm413_vm15 = vcmp.eq.s32.totalorder %v1568_v56, %v391_v18 }
  0xf8   : > { %1290 = vtanh.f32 %v586_v58  ;;  %v435_v47 = vsel %vm413_vm15, %v1574_v60, 0.0 }
  0xf9   : > { %1292 = vtanh.f32 %v581_v61  ;;  %v1083_v0 = vpop.f32.mrb[6].mxu1 }
  0xfa   : > { %v1283_v3 = vpop.eup %1282  ;;  %v596_v6 = vadd.f32 %v1083_v0, %v1559_v43  ;;  %v590_v7 = vpop.f32.mrb[7].mxu1 }
  0xfb   : > { %v1285_v8 = vpop.eup %1284  ;;  %v591_v10 = vadd.f32 %v1559_v43, %v590_v7  ;;  %v656_v11 = vmul.f32 %v1283_v3, %v424_v5 }
  0xfc   : > { %1294 = vtanh.f32 %v596_v6  ;;  %v655_v13 = vmul.f32 %v1285_v8, %v423_v9 }
  0xfd   : > { %1296 = vtanh.f32 %v591_v10  ;;  %v1086_v15 = vpop.f32.mrb[8].mxu1  ;;  %v743_v16 = vmul.f32 %v1283_v3, %v656_v11 }
  0xfe   : > { %v1287_v17 = vpop.eup %1286  ;;  %v606_v19 = vadd.f32 %v1086_v15, %v1559_v43  ;;  %v600_v20 = vpop.f32.mrb[9].mxu1  ;;  %v1178_v21 = vpack.c.bf16 %v656_v11, %v655_v13  ;;  %v742_v22 = vmul.f32 %v1285_v8, %v655_v13  ;;  %v431_v8 = vsel %vm409_vm10, %v1574_v60, 0.0 }
  0xff   : > { %v1289_v23 = vpop.eup %1288  ;;  %v601_v25 = vadd.f32 %v1559_v43, %v600_v20  ;;  %v759_v26 = vsub.f32 %v424_v5, %v743_v16  ;;  %v658_v27 = vmul.f32 %v1287_v17, %v426_v12 }
 0x100   : > { %1298 = vtanh.f32 %v606_v19  ;;  %1179 = vmatpush3.bf16.xpose.msra.mxu1 %v1178_v21  ;;  %v758_v29 = vsub.f32 %v423_v9, %v742_v22  ;;  %v657_v30 = vmul.f32 %v1289_v23, %v425_v14 }
 0x101   : > { %1300 = vtanh.f32 %v601_v25  ;;  %v1089_v32 = vpop.f32.mrb[10].mxu1  ;;  %1180 = vmatprep.subr.bf16.mxu1 %v1379_v39  ;;  %v745_v33 = vmul.f32 %v1287_v17, %v658_v27 }
 0x102   : > { %v1291_v34 = vpop.eup %1290  ;;  %v616_v35 = vadd.f32 %v1089_v32, %v1559_v43  ;;  %v610_v36 = vpop.f32.mrb[11].mxu1  ;;  %v1201_v37 = vpack.c.bf16 %v759_v26, %v758_v29  ;;  %v1181_v38 = vpack.c.bf16 %v658_v27, %v657_v30  ;;  %v744_v40 = vmul.f32 %v1289_v23, %v657_v30 }
 0x103   : > { %v1293_v41 = vpop.eup %1292  ;;  %v611_v42 = vadd.f32 %v1559_v43, %v610_v36  ;;  %v761_v44 = vsub.f32 %v426_v12, %v745_v33  ;;  %v1607_v45 = vmul.f32 %v1291_v34, %v428_v31  ;;  %v394_v12 = vpop.permute.xlu1 %393  ;;  %v434_v27 = vsel %vm412_vm12, %v1574_v60, 0.0 }
 0x104   : > { %1302 = vtanh.f32 %v616_v35  ;;  %1202 = vmatprep.subr.bf16.mxu0 %v1201_v37  ;;  %v760_v48 = vsub.f32 %v425_v14, %v744_v40  ;;  %v1612_v49 = vmul.f32 %v1293_v41, %v427_v28  ;;  %vm414_vm14 = vcmp.eq.s32.totalorder %v1568_v56, %v394_v12 }
 0x105   : > { %1304 = vtanh.f32 %v611_v42  ;;  %v1092_v51 = vpop.f32.mrb[12].mxu1  ;;  %1204 = vmatpush3.bf16.xpose.msra.mxu0 %v1201_v37  ;;  %v747_v52 = vmul.f32 %v1291_v34, %v1607_v45  ;;  %v397_v37 = vpop.permute.xlu0 %396 }
 0x106   : > { %v1295_v53 = vpop.eup %1294  ;;  %v626_v54 = vadd.f32 %v1092_v51, %v1559_v43  ;;  %v620_v55 = vpop.f32.mrb[13].mxu1  ;;  %v1205_v57 = vpack.c.bf16 %v761_v44, %v760_v48  ;;  %v746_v58 = vmul.f32 %v1293_v41, %v1612_v49  ;;  %v1184_v59 = vpack.c.bf16 %v1607_v45, %v1612_v49 }
 0x107   : > { %v1297_v61 = vpop.eup %1296  ;;  %v621_v0 = vadd.f32 %v1559_v43, %v620_v55  ;;  %v763_v3 = vsub.f32 %v428_v31, %v747_v52  ;;  %v1627_v5 = vmul.f32 %v1295_v53, %v430_v46  ;;  %v433_v31 = vsel %vm411_vm13, %v1574_v60, 0.0  ;;  %v400_v34 = vpop.permute.xlu1 %399 }
 0x108   : > { %1306 = vtanh.f32 %v626_v54  ;;  %1182 = vmatpush3.bf16.xpose.msra.mxu1 %v1181_v38  ;;  %1206 = vmatprep.subr.bf16.mxu0 %v1205_v57  ;;  %v762_v6 = vsub.f32 %v427_v28, %v746_v58  ;;  %v1629_v7 = vmul.f32 %v1297_v61, %v429_v62  ;;  %v436_v41 = vsel %vm414_vm14, %v1574_v60, 0.0 }
 0x109   : > { %1308 = vtanh.f32 %v621_v0  ;;  %v1095_v9 = vpop.f32.mrb[14].mxu1  ;;  %1183 = vmatprep.subr.bf16.mxu1 %v1379_v39  ;;  %v749_v10 = vmul.f32 %v1295_v53, %v1627_v5  ;;  %vm416_vm0 = vcmp.eq.s32.totalorder %v1568_v56, %v400_v34  ;;  %vm415_vm1 = vcmp.eq.s32.totalorder %v1568_v56, %v397_v37 }
 0x10a   : > { %v1299_v11 = vpop.eup %1298  ;;  %v636_v13 = vadd.f32 %v1095_v9, %v1559_v43  ;;  %v630_v14 = vpop.f32.mrb[15].mxu1  ;;  %v1209_v15 = vpack.c.bf16 %v763_v3, %v762_v6  ;;  %v748_v16 = vmul.f32 %v1297_v61, %v1629_v7  ;;  %v1187_v17 = vpack.c.bf16 %v1627_v5, %v1629_v7 }
 0x10b   : > { %v1301_v19 = vpop.eup %1300  ;;  %v631_v20 = vadd.f32 %v1559_v43, %v630_v14  ;;  %v765_v21 = vsub.f32 %v430_v46, %v749_v10  ;;  %v1646_v22 = vmul.f32 %v1299_v11, %v432_v63  ;;  %v438_v54 = vsel %vm416_vm0, %v1574_v60, 0.0 }
 0x10c   : > { %1310 = vtanh.f32 %v636_v13  ;;  %v764_v23 = vsub.f32 %v429_v62, %v748_v16  ;;  %v663_v24 = vmul.f32 %v1301_v19, %v431_v8  ;;  %v437_v61 = vsel %vm415_vm1, %v1574_v60, 0.0 }
 0x10d   : > { %1312 = vtanh.f32 %v631_v20  ;;  %1208 = vmatpush3.bf16.xpose.msra.mxu0 %v1205_v57  ;;  %v751_v25 = vmul.f32 %v1299_v11, %v1646_v22  ;;  %v1382_v60 = vmov 1.0  }
 0x10e   : > { %v1303_v26 = vpop.eup %1302  ;;  %1210 = vmatprep.subr.bf16.mxu0 %v1209_v15  ;;  %v1213_v28 = vpack.c.bf16 %v765_v21, %v764_v23  ;;  %v750_v29 = vmul.f32 %v1301_v19, %v663_v24  ;;  %v1190_v43 = vpack.c.bf16 %v1646_v22, %v663_v24 }
 0x10f   : > { %v1305_v30 = vpop.eup %1304  ;;  %v767_v32 = vsub.f32 %v432_v63, %v751_v25  ;;  %v666_v33 = vmul.f32 %v1303_v26, %v434_v27 }
 0x110   : > { %1185 = vmatpush3.bf16.xpose.msra.mxu1 %v1184_v59  ;;  %v766_v35 = vsub.f32 %v431_v8, %v750_v29  ;;  %v665_v36 = vmul.f32 %v1305_v30, %v433_v31 }
 0x111   : > { %1186 = vmatprep.subr.bf16.mxu1 %v1379_v39  ;;  %v753_v38 = vmul.f32 %v1303_v26, %v666_v33 }
 0x112   : > { %v1307_v40 = vpop.eup %1306  ;;  %v1217_v42 = vpack.c.bf16 %v767_v32, %v766_v35  ;;  %v752_v44 = vmul.f32 %v1305_v30, %v665_v36  ;;  %v1193_v45 = vpack.c.bf16 %v666_v33, %v665_v36 }
 0x113   : > { %v1309_v46 = vpop.eup %1308  ;;  %v769_v48 = vsub.f32 %v434_v27, %v753_v38  ;;  %v668_v49 = vmul.f32 %v1307_v40, %v436_v41 }
 0x114   : > { %v768_v50 = vsub.f32 %v433_v31, %v752_v44  ;;  %v667_v51 = vmul.f32 %v1309_v46, %v435_v47 }
 0x115   : > { %1212 = vmatpush3.bf16.xpose.msra.mxu0 %v1209_v15  ;;  %v755_v52 = vmul.f32 %v1307_v40, %v668_v49 }
 0x116   : > { %v1311_v53 = vpop.eup %1310  ;;  %1214 = vmatprep.subr.bf16.mxu0 %v1213_v28  ;;  %v1221_v55 = vpack.c.bf16 %v769_v48, %v768_v50  ;;  %v754_v57 = vmul.f32 %v1309_v46, %v667_v51  ;;  %v1196_v58 = vpack.c.bf16 %v668_v49, %v667_v51 }
 0x117   : > { %v1313_v59 = vpop.eup %1312  ;;  %v771_v62 = vsub.f32 %v436_v41, %v755_v52  ;;  %v670_v0 = vmul.f32 %v1311_v53, %v438_v54 }
 0x118   : > { %1188 = vmatpush3.bf16.xpose.msra.mxu1 %v1187_v17  ;;  %v770_v3 = vsub.f32 %v435_v47, %v754_v57  ;;  %v669_v5 = vmul.f32 %v1313_v59, %v437_v61 }
 0x119   : > { %1189 = vmatprep.subr.bf16.mxu1 %v1379_v39  ;;  %v757_v56 = vmul.f32 %v1311_v53, %v670_v0 }
 0x11a   : > { %v1225_v6 = vpack.c.bf16 %v771_v62, %v770_v3  ;;  %v756_v7 = vmul.f32 %v1313_v59, %v669_v5  ;;  %v1199_v8 = vpack.c.bf16 %v670_v0, %v669_v5 }
 0x11b   : > { %v773_v63 = vsub.f32 %v438_v54, %v757_v56 }
 0x11c   : > { %v772_v9 = vsub.f32 %v437_v61, %v756_v7 }
 0x11d   : > { %1216 = vmatpush3.bf16.xpose.msra.mxu0 %v1213_v28 }
 0x11e   : > { %1218 = vmatprep.subr.bf16.mxu0 %v1217_v42  ;;  %v1229_v10 = vpack.c.bf16 %v773_v63, %v772_v9 }
 0x120   : > { %1191 = vmatpush3.bf16.xpose.msra.mxu1 %v1190_v43 }
 0x121   : > { %1192 = vmatprep.subr.bf16.mxu1 %v1379_v39 }
 0x125   : > { %1220 = vmatpush3.bf16.xpose.msra.mxu0 %v1217_v42 }
 0x126   : > { %1222 = vmatprep.subr.bf16.mxu0 %v1221_v55 }
 0x128   : > { %1194 = vmatpush3.bf16.xpose.msra.mxu1 %v1193_v45 }
 0x129   : > { %1195 = vmatprep.subr.bf16.mxu1 %v1379_v39 }
 0x12d   : > { %1224 = vmatpush3.bf16.xpose.msra.mxu0 %v1221_v55 }
 0x12e   : > { %1226 = vmatprep.subr.bf16.mxu0 %v1225_v6 }
 0x130   : > { %1197 = vmatpush3.bf16.xpose.msra.mxu1 %v1196_v58 }
 0x131   : > { %1198 = vmatprep.subr.bf16.mxu1 %v1379_v39 }
 0x135   : > { %1228 = vmatpush3.bf16.xpose.msra.mxu0 %v1225_v6 }
 0x136   : > { %1230 = vmatprep.subr.bf16.mxu0 %v1229_v10 }
 0x138   : > { %1200 = vmatpush3.bf16.xpose.msra.mxu1 %v1199_v8 }
 0x13d   : > { %1232 = vmatpush3.bf16.xpose.msra.mxu0 %v1229_v10 }
 0x13f   : > { %1129 = vmatmul.mubr.f32.vlgmr.msra.gmra.mrb[16].mxu1 %v1382_v60 }
 0x144   : > { %1164 = vmatmul.mubr.f32.vlgmr.msra.gmra.mrb[0].mxu0 %v1481_v1 }
 0x145   : > { %1166 = vmatprep.mubr.f32.mxu0 %v1486_v2 }
 0x148   : > { %1167 = vmatmul.mubr.f32.gmra.mrb[2].mxu0 %v1493_v4 }
 0x212   : > { %v737_v39 = vpop.f32.mrb[16].mxu1 }
 0x213   : > { %741 = vst [vmem:[%s309_s8] sm:$0x1] %v737_v39  ;;  %v1130_v11 = vpop.f32.mrb[17].mxu1 }
 0x217   : > { %v1165_v12 = vpop.f32.mrb[0].mxu0 }
 0x218   : > { %860 = vst [vmem:[%s294_s13 + $0x8] sm:$0xff] %v1165_v12  ;;  %v840_v1 = vpop.f32.mrb[1].mxu0 }
 0x219   : > { %859 = vst [vmem:[%s294_s13] sm:$0xff] %v840_v1 }
 0x21b   : > { %v1168_v2 = vpop.f32.mrb[2].mxu0 }
 0x21c   : > { %862 = vst [vmem:[%s294_s13 + $0x18] sm:$0xff] %v1168_v2  ;;  %v850_v4 = vpop.f32.mrb[3].mxu0 }
 0x21d   : > { %861 = vst [vmem:[%s294_s13 + $0x10] sm:$0xff] %v850_v4 }
 0x21e   : > { %1327 = shalt.err (!%p1324_p4)
}
 0x21f   : > { %s1328_s22 = scalar_lea.hbm %s1681_s18, 512  ;;  %s1332_s9 = scalar_lea.hbm %s1731_s7, 1536 }
 0x220   : > { %p1329_p7 = scmp.ne.s32.totalorder %s1681_s18, %s1328_s22  ;;  %p1333_p10 = scmp.lt.u32.totalorder %s1681_s18, %s1731_s7 }
 0x221   : > { %p1334_p11 = scmp.lt.u32.totalorder %s1332_s9, %s1328_s22  ;;  %p1336_p13 = scmp.lt.u32.totalorder %s1328_s22, %s1681_s18 }
 0x222   : > { %p1330_p8 = pnand %p1329_p7, %p1465_p5 }
 0x223   : > { %p1335_p12 = por %p1334_p11, %p1333_p10 }
 0x224   : > { %p1331_p9 = pneg %p1330_p8 }
 0x225   : > { %p1337_p0 = por %p1336_p13, %p1335_p12 }
 0x227   : > { %p1338_p1 = pnand %p1337_p0, %p1331_p9 }
 0x229   : > { %1341 = shalt.err (!%p1338_p1)
}
 0x22a   : > { %s1384_s16 = smov 128   ;;  %s1385_s17 = smov 384  }
 0x22b   : > { %s1386_s28 = smov 8  }
 0x22c   : > { %1233 = dma.vmem_to_hbm [thread:$0]  (%p1465_p5), %s1676_s14, 512, %s1681_s18, %s1683_s19, %s1384_s16, %s1385_s17, %s1386_s28  }
 0x22d PF: > { %p1239_p2 = scmp.ge.s32.totalorder %s1376_s27, 2  ;;  %s903_s20 = sand.u32 1, %s1364_s24  }
 0x22e   : > { %s904_s21 = scalar_lea.sflag [#allocation3], %s903_s20 }
 0x22f   : > { %p1236_p3 = pnand %p1239_p2, %p1469_p6 }
 0x231   : > { %1359 = dma.done.wait (!%p1236_p3), %s904_s21, 512  }
 0x232   : > { %1361 = vsyncadd (!%p1236_p3), %s904_s21, 4294966784  ;;  %p18_p4 = scmp.ge.s32.totalorder %s1452_s30, 5   ;;  %s1734_s24 = smov %s1368_s25 }
 0x233   : > { %s1735_s25 = smov %s1372_s26  ;;  %s1736_s26 = smov %s1463_s10 }
 0x234   : > { %s1737_s27 = smov %s1452_s30  ;;  %20 = sbr.rel (!%p18_p4) target bundleno = 3 (0x3), region = 94 }
 0x23b   :  { %909 = vsyncpa [#allocation3], 1 }
 0x23c   :  { %911 = vsyncpa [#allocation3 + $0x1], 1 }

</bundles_post_ra>
